<compile_context>
chip_gen: v5e
topology: v5e:2x2
jax: 0.10.0
libtpu: 0.0.40
codegen_flags: <defaults>
</compile_context>

<pallas_src>
import functools
import math

import jax
import jax.numpy as jnp
import numpy as np
from jax.experimental import pallas as pl
from jax.experimental.pallas import tpu as pltpu


def _mhsa_kernel(q_ref, k_ref, v_ref,
                 wq_ref, wk_ref, wv_ref,
                 bq_ref, bk_ref, bv_ref,
                 *out_refs,
                 n_heads, d_k, d_v, mxu_dtype, return_attn):
    """One grid step = `Bb` batch elements (Bb = B folded, or 1), ALL heads.

    q_ref/k_ref/v_ref : (Bb, S, d_model)       f32 (cast in-kernel)
    w*_ref            : (d_model, H*d_head)    mxu_dtype (W_Q pre-scaled by 1/sqrt(d_k))
    b*_ref            : (1, H*d_head)          f32       (b_Q pre-scaled by 1/sqrt(d_k))
    out ctx_ref       : (Bb, S, H*d_v)         lane-dense single store
    out attn_ref      : (Bb, S, H*S)           lane-dense single store (optional)
    """
    f32 = jnp.float32
    ctx_ref = out_refs[0]
    attn_ref = out_refs[1] if return_attn else None

    Bb, S, d_model = q_ref.shape

    # In-kernel cast: inputs arrive as f32 straight from HBM, cast once in VMEM.
    q_in = q_ref[...].reshape(Bb * S, d_model).astype(mxu_dtype)
    k_in = k_ref[...].reshape(Bb * S, d_model).astype(mxu_dtype)
    v_in = v_ref[...].reshape(Bb * S, d_model).astype(mxu_dtype)

    # One wide MXU matmul per projection (all heads, all resident batch rows),
    # f32 accumulation; bias add in f32.
    q = jnp.dot(q_in, wq_ref[...], preferred_element_type=f32) + bq_ref[...]
    k = jnp.dot(k_in, wk_ref[...], preferred_element_type=f32) + bk_ref[...]
    v = jnp.dot(v_in, wv_ref[...], preferred_element_type=f32) + bv_ref[...]

    # Single full-width cast per projected tensor (not per 8-lane head slice).
    q = q.reshape(Bb, S, n_heads * d_k).astype(mxu_dtype)
    k = k.reshape(Bb, S, n_heads * d_k).astype(mxu_dtype)
    v = v.reshape(Bb, S, n_heads * d_v).astype(mxu_dtype)

    approx_recip = mxu_dtype != jnp.float32   # exact only on the f32 path

    ctx_parts = []
    attn_parts = []
    # n_heads is tiny and static -> unrolled Python loop over head slices.
    for h in range(n_heads):
        q_h = q[:, :, h * d_k:(h + 1) * d_k]            # (Bb, S, d_k)
        k_h = k[:, :, h * d_k:(h + 1) * d_k]
        v_h = v[:, :, h * d_v:(h + 1) * d_v]

        # Contract last dims directly (batched), no explicit k.T materialization.
        scores = jnp.einsum("bqd,bkd->bqk", q_h, k_h,
                            preferred_element_type=f32)  # (Bb, S, S) f32
        # exp-"softmax" exactly as in the module (no max subtraction), f32 math.
        scores = jnp.exp(scores)
        denom = jnp.sum(scores, axis=-1, keepdims=True) + jnp.float32(1e-8)
        attn_h = scores * pl.reciprocal(denom, approx=approx_recip)

        ctx_h = jnp.einsum("bqk,bkd->bqd", attn_h.astype(mxu_dtype), v_h,
                           preferred_element_type=f32)   # (Bb, S, d_v)
        ctx_parts.append(ctx_h)
        if return_attn:
            attn_parts.append(attn_h)

    # One lane-dense store each; head order matches the torch layout.
    ctx_ref[...] = jnp.concatenate(ctx_parts, axis=-1).astype(ctx_ref.dtype)
    if return_attn:
        attn_ref[...] = jnp.concatenate(attn_parts, axis=-1)


def pack_attention_params(params, *, n_heads, d_k, d_v, mxu_dtype=jnp.bfloat16):
    """One-time weight packing — call at parameter-init time, NOT per forward.

    torch Linear: y = x @ W.T + b, W: (out_features, in_features).  All heads
    are concatenated into one (d_model, H*d) slab and the 1/sqrt(d_k) score
    scale is folded into the Q projection (weight + bias).
    """
    scale = jnp.float32(1.0 / math.sqrt(d_k))
    return {
        "wq": (params["W_Q_w"].T * scale).astype(mxu_dtype),   # (d_model, H*d_k)
        "wk": params["W_K_w"].T.astype(mxu_dtype),             # (d_model, H*d_k)
        "wv": params["W_V_w"].T.astype(mxu_dtype),             # (d_model, H*d_v)
        "bq": (params["W_Q_b"] * scale).reshape(1, n_heads * d_k).astype(jnp.float32),
        "bk": params["W_K_b"].reshape(1, n_heads * d_k).astype(jnp.float32),
        "bv": params["W_V_b"].reshape(1, n_heads * d_v).astype(jnp.float32),
        "mxu_dtype": mxu_dtype,
    }


def _should_fold_batch():
    """Fold B into one grid step on single-TC chips (v5e/v6e); keep a parallel
    batch grid on dual-TC v7x so the second TensorCore is used."""
    try:
        kind = jax.devices()[0].device_kind.lower()
    except Exception:
        return True
    return not any(tag in kind for tag in ("v7", "7x"))


def multi_head_self_attention(Q, K, V, packed, *, n_heads, d_k, d_v,
                              return_attn=True, fold_batch=None,
                              ctx_dtype=jnp.float32):
    """Q, K, V: (B, S, d_model) float32.

    Returns (context (B, S, n_heads*d_v), attn (B, n_heads, S, S) f32) when
    return_attn=True (matching the PyTorch forward, attn_mask=None path);
    otherwise returns only the context (no attention writeback at all).
    """
    B, S, d_model = Q.shape
    mxu_dtype = packed["mxu_dtype"]
    if fold_batch is None:
        fold_batch = _should_fold_batch() or B == 1

    Bb = B if fold_batch else 1
    grid = (1,) if fold_batch else (B,)
    seq_map = (lambda i: (0, 0, 0)) if fold_batch else (lambda b: (b, 0, 0))
    w_map = lambda i: (0, 0)

    seq_spec = pl.BlockSpec((Bb, S, d_model), seq_map)
    wk_spec = pl.BlockSpec((d_model, n_heads * d_k), w_map)
    wv_spec = pl.BlockSpec((d_model, n_heads * d_v), w_map)
    bk_spec = pl.BlockSpec((1, n_heads * d_k), w_map)
    bv_spec = pl.BlockSpec((1, n_heads * d_v), w_map)

    ctx_shape = jax.ShapeDtypeStruct((B, S, n_heads * d_v), ctx_dtype)
    ctx_spec = pl.BlockSpec((Bb, S, n_heads * d_v), seq_map)
    if return_attn:
        # Lane-dense attn slab; reshaped to (B, H, S, S) in the wrapper.
        out_shape = (ctx_shape,
                     jax.ShapeDtypeStruct((B, S, n_heads * S), jnp.float32))
        out_specs = (ctx_spec,
                     pl.BlockSpec((Bb, S, n_heads * S), seq_map))
    else:
        out_shape = ctx_shape
        out_specs = ctx_spec

    kernel = pl.pallas_call(
        functools.partial(_mhsa_kernel, n_heads=n_heads, d_k=d_k, d_v=d_v,
                          mxu_dtype=mxu_dtype, return_attn=return_attn),
        out_shape=out_shape,
        grid_spec=pltpu.PrefetchScalarGridSpec(
            num_scalar_prefetch=0,
            grid=grid,
            in_specs=[seq_spec, seq_spec, seq_spec,
                      wk_spec, wk_spec, wv_spec,
                      bk_spec, bk_spec, bv_spec],
            out_specs=out_specs),
        compiler_params=pltpu.CompilerParams(
            dimension_semantics=("arbitrary",) if fold_batch else ("parallel",),
            vmem_limit_bytes=32 * 1024 * 1024),
    )
    outs = kernel(Q, K, V,
                  packed["wq"], packed["wk"], packed["wv"],
                  packed["bq"], packed["bk"], packed["bv"])
    if return_attn:
        ctx, attn_slab = outs
        attn = attn_slab.reshape(B, S, n_heads, S).transpose(0, 2, 1, 3)
        return ctx, attn
    return outs


def _reference(Q, K, V, params, *, n_heads, d_k, d_v):
    """Pure-JAX reference mirroring the PyTorch forward (f32 throughout)."""
    B, S, d_model = Q.shape

    def lin(x, w, b):
        return x @ w.T + b

    q_s = lin(Q, params["W_Q_w"], params["W_Q_b"]).reshape(B, S, n_heads, d_k).transpose(0, 2, 1, 3)
    k_s = lin(K, params["W_K_w"], params["W_K_b"]).reshape(B, S, n_heads, d_k).transpose(0, 2, 1, 3)
    v_s = lin(V, params["W_V_w"], params["W_V_b"]).reshape(B, S, n_heads, d_v).transpose(0, 2, 1, 3)

    scores = jnp.einsum("bhqd,bhkd->bhqk", q_s, k_s) / np.sqrt(d_k)
    scores = jnp.exp(scores)
    attn = scores / (jnp.sum(scores, axis=-1, keepdims=True) + 1e-08)
    ctx = jnp.einsum("bhqk,bhkd->bhqd", attn, v_s)
    return ctx.transpose(0, 2, 1, 3).reshape(B, S, n_heads * d_v), attn


def _xavier_uniform(key, out_f, in_f):
    limit = math.sqrt(6.0 / (in_f + out_f))
    return jax.random.uniform(key, (out_f, in_f), jnp.float32, -limit, limit)


if __name__ == "__main__":
    # Small shapes consistent with the module's forward.
    B, S, d_model = 2, 8, 32
    n_heads, d_k, d_v = 4, 8, 8

    key = jax.random.PRNGKey(0)
    keys = jax.random.split(key, 10)

    blim = 1.0 / math.sqrt(d_model)
    params = {
        "W_Q_w": _xavier_uniform(keys[0], n_heads * d_k, d_model),
        "W_K_w": _xavier_uniform(keys[1], n_heads * d_k, d_model),
        "W_V_w": _xavier_uniform(keys[2], n_heads * d_v, d_model),
        "W_Q_b": jax.random.uniform(keys[3], (n_heads * d_k,), jnp.float32, -blim, blim),
        "W_K_b": jax.random.uniform(keys[4], (n_heads * d_k,), jnp.float32, -blim, blim),
        "W_V_b": jax.random.uniform(keys[5], (n_heads * d_v,), jnp.float32, -blim, blim),
    }

    Q = jax.random.normal(keys[6], (B, S, d_model), jnp.float32)
    K = jax.random.normal(keys[7], (B, S, d_model), jnp.float32)
    V = jax.random.normal(keys[8], (B, S, d_model), jnp.float32)

    ref_ctx, ref_attn = _reference(Q, K, V, params, n_heads=n_heads, d_k=d_k, d_v=d_v)

    # One-time weight packing (init-time, not per-call).
    packed_f32 = pack_attention_params(params, n_heads=n_heads, d_k=d_k, d_v=d_v,
                                       mxu_dtype=jnp.float32)
    packed_bf16 = pack_attention_params(params, n_heads=n_heads, d_k=d_k, d_v=d_v,
                                        mxu_dtype=jnp.bfloat16)

    # f32 MXU operands: tight-tolerance check on BOTH grid layouts
    # (folded single-step for v5e/v6e, per-batch parallel grid for v7x).
    for fold in (True, False):
        ctx32, attn32 = multi_head_self_attention(
            Q, K, V, packed_f32, n_heads=n_heads, d_k=d_k, d_v=d_v,
            return_attn=True, fold_batch=fold)
        ctx32 = jax.block_until_ready(ctx32)
        assert ctx32.shape == (B, S, n_heads * d_v), ctx32.shape
        assert attn32.shape == (B, n_heads, S, S), attn32.shape
        np.testing.assert_allclose(np.asarray(ctx32), np.asarray(ref_ctx), rtol=2e-5, atol=2e-5)
        np.testing.assert_allclose(np.asarray(attn32), np.asarray(ref_attn), rtol=2e-5, atol=2e-5)

    # bf16 MXU operands (fast path; approx EUP reciprocal), auto grid layout.
    ctx_bf, attn_bf = multi_head_self_attention(
        Q, K, V, packed_bf16, n_heads=n_heads, d_k=d_k, d_v=d_v, return_attn=True)
    ctx_bf = jax.block_until_ready(ctx_bf)
    np.testing.assert_allclose(np.asarray(ctx_bf), np.asarray(ref_ctx), rtol=1e-1, atol=5e-2)
    np.testing.assert_allclose(np.asarray(attn_bf), np.asarray(ref_attn), rtol=1e-1, atol=5e-2)

    # Context-only fast path: no O(S^2) attention writeback at all.
    ctx_only = multi_head_self_attention(
        Q, K, V, packed_bf16, n_heads=n_heads, d_k=d_k, d_v=d_v, return_attn=False)
    ctx_only = jax.block_until_ready(ctx_only)
    np.testing.assert_allclose(np.asarray(ctx_only), np.asarray(ref_ctx), rtol=1e-1, atol=5e-2)

    print("KERNEL_OK")
</pallas_src>

<mosaic_0001>
module attributes {stable_mosaic.version = 11 : i64} {
  func.func @_mhsa_kernel(%arg0: i32, %arg1: memref<2x8x32xf32, #tpu.memory_space<vmem>>, %arg2: memref<2x8x32xf32, #tpu.memory_space<vmem>>, %arg3: memref<2x8x32xf32, #tpu.memory_space<vmem>>, %arg4: memref<32x32xf32, #tpu.memory_space<vmem>>, %arg5: memref<32x32xf32, #tpu.memory_space<vmem>>, %arg6: memref<32x32xf32, #tpu.memory_space<vmem>>, %arg7: memref<1x32xf32, #tpu.memory_space<vmem>>, %arg8: memref<1x32xf32, #tpu.memory_space<vmem>>, %arg9: memref<1x32xf32, #tpu.memory_space<vmem>>, %arg10: memref<2x8x32xf32, #tpu.memory_space<vmem>>, %arg11: memref<2x8x32xf32, #tpu.memory_space<vmem>>) attributes {dimension_semantics = [#tpu.dimension_semantics<arbitrary>], iteration_bounds = array<i64: 1>, scalar_prefetch = 0 : i64, scratch_operands = 0 : i64, tpu.core_type = #tpu.core_type<tc>, window_params = [{pipeline_mode = #tpu.pipeline_mode<synchronous>, transform_indices = @transform_0, window_bounds = array<i64: 2, 8, 32>}, {pipeline_mode = #tpu.pipeline_mode<synchronous>, transform_indices = @transform_1, window_bounds = array<i64: 2, 8, 32>}, {pipeline_mode = #tpu.pipeline_mode<synchronous>, transform_indices = @transform_2, window_bounds = array<i64: 2, 8, 32>}, {pipeline_mode = #tpu.pipeline_mode<synchronous>, transform_indices = @transform_3, window_bounds = array<i64: 32, 32>}, {pipeline_mode = #tpu.pipeline_mode<synchronous>, transform_indices = @transform_4, window_bounds = array<i64: 32, 32>}, {pipeline_mode = #tpu.pipeline_mode<synchronous>, transform_indices = @transform_5, window_bounds = array<i64: 32, 32>}, {pipeline_mode = #tpu.pipeline_mode<synchronous>, transform_indices = @transform_6, window_bounds = array<i64: 1, 32>}, {pipeline_mode = #tpu.pipeline_mode<synchronous>, transform_indices = @transform_7, window_bounds = array<i64: 1, 32>}, {pipeline_mode = #tpu.pipeline_mode<synchronous>, transform_indices = @transform_8, window_bounds = array<i64: 1, 32>}, {pipeline_mode = #tpu.pipeline_mode<synchronous>, transform_indices = @transform_9, window_bounds = array<i64: 2, 8, 32>}, {pipeline_mode = #tpu.pipeline_mode<synchronous>, transform_indices = @transform_10, window_bounds = array<i64: 2, 8, 32>}]} {
    %c0 = arith.constant 0 : index
    %c0_0 = arith.constant 0 : index
    %c0_1 = arith.constant 0 : index
    %0 = vector.load %arg1[%c0, %c0_0, %c0_1] : memref<2x8x32xf32, #tpu.memory_space<vmem>>, vector<2x8x32xf32>
    %1 = vector.shape_cast %0 : vector<2x8x32xf32> to vector<16x32xf32>
    %c0_2 = arith.constant 0 : index
    %c0_3 = arith.constant 0 : index
    %c0_4 = arith.constant 0 : index
    %2 = vector.load %arg2[%c0_2, %c0_3, %c0_4] : memref<2x8x32xf32, #tpu.memory_space<vmem>>, vector<2x8x32xf32>
    %3 = vector.shape_cast %2 : vector<2x8x32xf32> to vector<16x32xf32>
    %c0_5 = arith.constant 0 : index
    %c0_6 = arith.constant 0 : index
    %c0_7 = arith.constant 0 : index
    %4 = vector.load %arg3[%c0_5, %c0_6, %c0_7] : memref<2x8x32xf32, #tpu.memory_space<vmem>>, vector<2x8x32xf32>
    %5 = vector.shape_cast %4 : vector<2x8x32xf32> to vector<16x32xf32>
    %c0_8 = arith.constant 0 : index
    %c0_9 = arith.constant 0 : index
    %6 = vector.load %arg4[%c0_8, %c0_9] : memref<32x32xf32, #tpu.memory_space<vmem>>, vector<32x32xf32>
    %cst = arith.constant dense<0.000000e+00> : vector<16x32xf32>
    %7 = tpu.matmul %1, %6, %cst {dimension_numbers = #tpu.dot_dimension_numbers<[1], [0], [0], [1], [0, 0, 1, 1], [], []>} : vector<16x32xf32>, vector<32x32xf32>, vector<16x32xf32> -> vector<16x32xf32>
    %c0_10 = arith.constant 0 : index
    %c0_11 = arith.constant 0 : index
    %8 = vector.load %arg7[%c0_10, %c0_11] : memref<1x32xf32, #tpu.memory_space<vmem>>, vector<1x32xf32>
    %9 = vector.broadcast %8 : vector<1x32xf32> to vector<16x32xf32>
    %10 = arith.addf %7, %9 : vector<16x32xf32>
    %c0_12 = arith.constant 0 : index
    %c0_13 = arith.constant 0 : index
    %11 = vector.load %arg5[%c0_12, %c0_13] : memref<32x32xf32, #tpu.memory_space<vmem>>, vector<32x32xf32>
    %cst_14 = arith.constant dense<0.000000e+00> : vector<16x32xf32>
    %12 = tpu.matmul %3, %11, %cst_14 {dimension_numbers = #tpu.dot_dimension_numbers<[1], [0], [0], [1], [0, 0, 1, 1], [], []>} : vector<16x32xf32>, vector<32x32xf32>, vector<16x32xf32> -> vector<16x32xf32>
    %c0_15 = arith.constant 0 : index
    %c0_16 = arith.constant 0 : index
    %13 = vector.load %arg8[%c0_15, %c0_16] : memref<1x32xf32, #tpu.memory_space<vmem>>, vector<1x32xf32>
    %14 = vector.broadcast %13 : vector<1x32xf32> to vector<16x32xf32>
    %15 = arith.addf %12, %14 : vector<16x32xf32>
    %c0_17 = arith.constant 0 : index
    %c0_18 = arith.constant 0 : index
    %16 = vector.load %arg6[%c0_17, %c0_18] : memref<32x32xf32, #tpu.memory_space<vmem>>, vector<32x32xf32>
    %cst_19 = arith.constant dense<0.000000e+00> : vector<16x32xf32>
    %17 = tpu.matmul %5, %16, %cst_19 {dimension_numbers = #tpu.dot_dimension_numbers<[1], [0], [0], [1], [0, 0, 1, 1], [], []>} : vector<16x32xf32>, vector<32x32xf32>, vector<16x32xf32> -> vector<16x32xf32>
    %c0_20 = arith.constant 0 : index
    %c0_21 = arith.constant 0 : index
    %18 = vector.load %arg9[%c0_20, %c0_21] : memref<1x32xf32, #tpu.memory_space<vmem>>, vector<1x32xf32>
    %19 = vector.broadcast %18 : vector<1x32xf32> to vector<16x32xf32>
    %20 = arith.addf %17, %19 : vector<16x32xf32>
    %21 = vector.shape_cast %10 : vector<16x32xf32> to vector<2x8x32xf32>
    %22 = vector.shape_cast %15 : vector<16x32xf32> to vector<2x8x32xf32>
    %23 = vector.shape_cast %20 : vector<16x32xf32> to vector<2x8x32xf32>
    %24 = vector.extract_strided_slice %21 {offsets = [0, 0, 0], sizes = [2, 8, 8], strides = [1, 1, 1]} : vector<2x8x32xf32> to vector<2x8x8xf32>
    %25 = vector.extract_strided_slice %22 {offsets = [0, 0, 0], sizes = [2, 8, 8], strides = [1, 1, 1]} : vector<2x8x32xf32> to vector<2x8x8xf32>
    %26 = vector.extract_strided_slice %23 {offsets = [0, 0, 0], sizes = [2, 8, 8], strides = [1, 1, 1]} : vector<2x8x32xf32> to vector<2x8x8xf32>
    "tpu.trace_start"() <{level = 10 : i32, message = "bqd,bkd->bqk"}> : () -> ()
    %cst_22 = arith.constant dense<0.000000e+00> : vector<2x8x8xf32>
    %27 = tpu.matmul %24, %25, %cst_22 {dimension_numbers = #tpu.dot_dimension_numbers<[2], [2], [1], [1], [0, 0, 0, 1, 1, 1], [0], [0]>} : vector<2x8x8xf32>, vector<2x8x8xf32>, vector<2x8x8xf32> -> vector<2x8x8xf32>
    "tpu.trace_stop"() : () -> ()
    %28 = math.exp %27 : vector<2x8x8xf32>
    %cst_23 = arith.constant dense<0.000000e+00> : vector<2x8xf32>
    %29 = vector.multi_reduction <add>, %28, %cst_23 [2] : vector<2x8x8xf32> to vector<2x8xf32>
    %30 = vector.shape_cast %29 : vector<2x8xf32> to vector<2x8x1xf32>
    %cst_24 = arith.constant 9.99999993E-9 : f32
    %31 = vector.broadcast %cst_24 : f32 to vector<2x8x1xf32>
    %32 = arith.addf %30, %31 : vector<2x8x1xf32>
    %33 = tpu.reciprocal %32 : vector<2x8x1xf32> -> vector<2x8x1xf32>
    %34 = vector.broadcast %33 : vector<2x8x1xf32> to vector<2x8x8xf32>
    %35 = arith.mulf %28, %34 : vector<2x8x8xf32>
    "tpu.trace_start"() <{level = 10 : i32, message = "bqk,bkd->bqd"}> : () -> ()
    %cst_25 = arith.constant dense<0.000000e+00> : vector<2x8x8xf32>
    %36 = tpu.matmul %35, %26, %cst_25 {dimension_numbers = #tpu.dot_dimension_numbers<[2], [1], [1], [2], [0, 0, 0, 1, 1, 2], [0], [0]>} : vector<2x8x8xf32>, vector<2x8x8xf32>, vector<2x8x8xf32> -> vector<2x8x8xf32>
    "tpu.trace_stop"() : () -> ()
    %37 = vector.extract_strided_slice %21 {offsets = [0, 0, 8], sizes = [2, 8, 8], strides = [1, 1, 1]} : vector<2x8x32xf32> to vector<2x8x8xf32>
    %38 = vector.extract_strided_slice %22 {offsets = [0, 0, 8], sizes = [2, 8, 8], strides = [1, 1, 1]} : vector<2x8x32xf32> to vector<2x8x8xf32>
    %39 = vector.extract_strided_slice %23 {offsets = [0, 0, 8], sizes = [2, 8, 8], strides = [1, 1, 1]} : vector<2x8x32xf32> to vector<2x8x8xf32>
    "tpu.trace_start"() <{level = 10 : i32, message = "bqd,bkd->bqk"}> : () -> ()
    %cst_26 = arith.constant dense<0.000000e+00> : vector<2x8x8xf32>
    %40 = tpu.matmul %37, %38, %cst_26 {dimension_numbers = #tpu.dot_dimension_numbers<[2], [2], [1], [1], [0, 0, 0, 1, 1, 1], [0], [0]>} : vector<2x8x8xf32>, vector<2x8x8xf32>, vector<2x8x8xf32> -> vector<2x8x8xf32>
    "tpu.trace_stop"() : () -> ()
    %41 = math.exp %40 : vector<2x8x8xf32>
    %cst_27 = arith.constant dense<0.000000e+00> : vector<2x8xf32>
    %42 = vector.multi_reduction <add>, %41, %cst_27 [2] : vector<2x8x8xf32> to vector<2x8xf32>
    %43 = vector.shape_cast %42 : vector<2x8xf32> to vector<2x8x1xf32>
    %cst_28 = arith.constant 9.99999993E-9 : f32
    %44 = vector.broadcast %cst_28 : f32 to vector<2x8x1xf32>
    %45 = arith.addf %43, %44 : vector<2x8x1xf32>
    %46 = tpu.reciprocal %45 : vector<2x8x1xf32> -> vector<2x8x1xf32>
    %47 = vector.broadcast %46 : vector<2x8x1xf32> to vector<2x8x8xf32>
    %48 = arith.mulf %41, %47 : vector<2x8x8xf32>
    "tpu.trace_start"() <{level = 10 : i32, message = "bqk,bkd->bqd"}> : () -> ()
    %cst_29 = arith.constant dense<0.000000e+00> : vector<2x8x8xf32>
    %49 = tpu.matmul %48, %39, %cst_29 {dimension_numbers = #tpu.dot_dimension_numbers<[2], [1], [1], [2], [0, 0, 0, 1, 1, 2], [0], [0]>} : vector<2x8x8xf32>, vector<2x8x8xf32>, vector<2x8x8xf32> -> vector<2x8x8xf32>
    "tpu.trace_stop"() : () -> ()
    %50 = vector.extract_strided_slice %21 {offsets = [0, 0, 16], sizes = [2, 8, 8], strides = [1, 1, 1]} : vector<2x8x32xf32> to vector<2x8x8xf32>
    %51 = vector.extract_strided_slice %22 {offsets = [0, 0, 16], sizes = [2, 8, 8], strides = [1, 1, 1]} : vector<2x8x32xf32> to vector<2x8x8xf32>
    %52 = vector.extract_strided_slice %23 {offsets = [0, 0, 16], sizes = [2, 8, 8], strides = [1, 1, 1]} : vector<2x8x32xf32> to vector<2x8x8xf32>
    "tpu.trace_start"() <{level = 10 : i32, message = "bqd,bkd->bqk"}> : () -> ()
    %cst_30 = arith.constant dense<0.000000e+00> : vector<2x8x8xf32>
    %53 = tpu.matmul %50, %51, %cst_30 {dimension_numbers = #tpu.dot_dimension_numbers<[2], [2], [1], [1], [0, 0, 0, 1, 1, 1], [0], [0]>} : vector<2x8x8xf32>, vector<2x8x8xf32>, vector<2x8x8xf32> -> vector<2x8x8xf32>
    "tpu.trace_stop"() : () -> ()
    %54 = math.exp %53 : vector<2x8x8xf32>
    %cst_31 = arith.constant dense<0.000000e+00> : vector<2x8xf32>
    %55 = vector.multi_reduction <add>, %54, %cst_31 [2] : vector<2x8x8xf32> to vector<2x8xf32>
    %56 = vector.shape_cast %55 : vector<2x8xf32> to vector<2x8x1xf32>
    %cst_32 = arith.constant 9.99999993E-9 : f32
    %57 = vector.broadcast %cst_32 : f32 to vector<2x8x1xf32>
    %58 = arith.addf %56, %57 : vector<2x8x1xf32>
    %59 = tpu.reciprocal %58 : vector<2x8x1xf32> -> vector<2x8x1xf32>
    %60 = vector.broadcast %59 : vector<2x8x1xf32> to vector<2x8x8xf32>
    %61 = arith.mulf %54, %60 : vector<2x8x8xf32>
    "tpu.trace_start"() <{level = 10 : i32, message = "bqk,bkd->bqd"}> : () -> ()
    %cst_33 = arith.constant dense<0.000000e+00> : vector<2x8x8xf32>
    %62 = tpu.matmul %61, %52, %cst_33 {dimension_numbers = #tpu.dot_dimension_numbers<[2], [1], [1], [2], [0, 0, 0, 1, 1, 2], [0], [0]>} : vector<2x8x8xf32>, vector<2x8x8xf32>, vector<2x8x8xf32> -> vector<2x8x8xf32>
    "tpu.trace_stop"() : () -> ()
    %63 = vector.extract_strided_slice %21 {offsets = [0, 0, 24], sizes = [2, 8, 8], strides = [1, 1, 1]} : vector<2x8x32xf32> to vector<2x8x8xf32>
    %64 = vector.extract_strided_slice %22 {offsets = [0, 0, 24], sizes = [2, 8, 8], strides = [1, 1, 1]} : vector<2x8x32xf32> to vector<2x8x8xf32>
    %65 = vector.extract_strided_slice %23 {offsets = [0, 0, 24], sizes = [2, 8, 8], strides = [1, 1, 1]} : vector<2x8x32xf32> to vector<2x8x8xf32>
    "tpu.trace_start"() <{level = 10 : i32, message = "bqd,bkd->bqk"}> : () -> ()
    %cst_34 = arith.constant dense<0.000000e+00> : vector<2x8x8xf32>
    %66 = tpu.matmul %63, %64, %cst_34 {dimension_numbers = #tpu.dot_dimension_numbers<[2], [2], [1], [1], [0, 0, 0, 1, 1, 1], [0], [0]>} : vector<2x8x8xf32>, vector<2x8x8xf32>, vector<2x8x8xf32> -> vector<2x8x8xf32>
    "tpu.trace_stop"() : () -> ()
    %67 = math.exp %66 : vector<2x8x8xf32>
    %cst_35 = arith.constant dense<0.000000e+00> : vector<2x8xf32>
    %68 = vector.multi_reduction <add>, %67, %cst_35 [2] : vector<2x8x8xf32> to vector<2x8xf32>
    %69 = vector.shape_cast %68 : vector<2x8xf32> to vector<2x8x1xf32>
    %cst_36 = arith.constant 9.99999993E-9 : f32
    %70 = vector.broadcast %cst_36 : f32 to vector<2x8x1xf32>
    %71 = arith.addf %69, %70 : vector<2x8x1xf32>
    %72 = tpu.reciprocal %71 : vector<2x8x1xf32> -> vector<2x8x1xf32>
    %73 = vector.broadcast %72 : vector<2x8x1xf32> to vector<2x8x8xf32>
    %74 = arith.mulf %67, %73 : vector<2x8x8xf32>
    "tpu.trace_start"() <{level = 10 : i32, message = "bqk,bkd->bqd"}> : () -> ()
    %cst_37 = arith.constant dense<0.000000e+00> : vector<2x8x8xf32>
    %75 = tpu.matmul %74, %65, %cst_37 {dimension_numbers = #tpu.dot_dimension_numbers<[2], [1], [1], [2], [0, 0, 0, 1, 1, 2], [0], [0]>} : vector<2x8x8xf32>, vector<2x8x8xf32>, vector<2x8x8xf32> -> vector<2x8x8xf32>
    "tpu.trace_stop"() : () -> ()
    %76 = tpu.concatenate %36, %49, %62, %75 in 2 : vector<2x8x8xf32>, vector<2x8x8xf32>, vector<2x8x8xf32>, vector<2x8x8xf32> -> vector<2x8x32xf32>
    %c0_38 = arith.constant 0 : index
    %c0_39 = arith.constant 0 : index
    %c0_40 = arith.constant 0 : index
    %77 = vector.load %arg10[%c0_38, %c0_39, %c0_40] : memref<2x8x32xf32, #tpu.memory_space<vmem>>, vector<2x8x32xf32>
    tpu.vector_store %arg10[%c0_38, %c0_39, %c0_40], %76 {strides = array<i32>} : memref<2x8x32xf32, #tpu.memory_space<vmem>>, vector<2x8x32xf32>,
    %78 = tpu.concatenate %35, %48, %61, %74 in 2 : vector<2x8x8xf32>, vector<2x8x8xf32>, vector<2x8x8xf32>, vector<2x8x8xf32> -> vector<2x8x32xf32>
    %c0_41 = arith.constant 0 : index
    %c0_42 = arith.constant 0 : index
    %c0_43 = arith.constant 0 : index
    %79 = vector.load %arg11[%c0_41, %c0_42, %c0_43] : memref<2x8x32xf32, #tpu.memory_space<vmem>>, vector<2x8x32xf32>
    tpu.vector_store %arg11[%c0_41, %c0_42, %c0_43], %78 {strides = array<i32>} : memref<2x8x32xf32, #tpu.memory_space<vmem>>, vector<2x8x32xf32>,
    return
  }
  func.func @transform_0(%arg0: i32) -> (i32, i32, i32) {
    %c0_i32 = arith.constant 0 : i32
    %c0_i32_0 = arith.constant 0 : i32
    %c0_i32_1 = arith.constant 0 : i32
    %c0_i32_2 = arith.constant 0 : i32
    return %c0_i32, %c0_i32_0, %c0_i32_1 : i32, i32, i32
  }
  func.func @transform_1(%arg0: i32) -> (i32, i32, i32) {
    %c0_i32 = arith.constant 0 : i32
    %c0_i32_0 = arith.constant 0 : i32
    %c0_i32_1 = arith.constant 0 : i32
    %c0_i32_2 = arith.constant 0 : i32
    return %c0_i32, %c0_i32_0, %c0_i32_1 : i32, i32, i32
  }
  func.func @transform_2(%arg0: i32) -> (i32, i32, i32) {
    %c0_i32 = arith.constant 0 : i32
    %c0_i32_0 = arith.constant 0 : i32
    %c0_i32_1 = arith.constant 0 : i32
    %c0_i32_2 = arith.constant 0 : i32
    return %c0_i32, %c0_i32_0, %c0_i32_1 : i32, i32, i32
  }
  func.func @transform_3(%arg0: i32) -> (i32, i32) {
    %c0_i32 = arith.constant 0 : i32
    %c0_i32_0 = arith.constant 0 : i32
    %c0_i32_1 = arith.constant 0 : i32
    return %c0_i32, %c0_i32_0 : i32, i32
  }
  func.func @transform_4(%arg0: i32) -> (i32, i32) {
    %c0_i32 = arith.constant 0 : i32
    %c0_i32_0 = arith.constant 0 : i32
    %c0_i32_1 = arith.constant 0 : i32
    return %c0_i32, %c0_i32_0 : i32, i32
  }
  func.func @transform_5(%arg0: i32) -> (i32, i32) {
    %c0_i32 = arith.constant 0 : i32
    %c0_i32_0 = arith.constant 0 : i32
    %c0_i32_1 = arith.constant 0 : i32
    return %c0_i32, %c0_i32_0 : i32, i32
  }
  func.func @transform_6(%arg0: i32) -> (i32, i32) {
    %c0_i32 = arith.constant 0 : i32
    %c0_i32_0 = arith.constant 0 : i32
    %c0_i32_1 = arith.constant 0 : i32
    return %c0_i32, %c0_i32_0 : i32, i32
  }
  func.func @transform_7(%arg0: i32) -> (i32, i32) {
    %c0_i32 = arith.constant 0 : i32
    %c0_i32_0 = arith.constant 0 : i32
    %c0_i32_1 = arith.constant 0 : i32
    return %c0_i32, %c0_i32_0 : i32, i32
  }
  func.func @transform_8(%arg0: i32) -> (i32, i32) {
    %c0_i32 = arith.constant 0 : i32
    %c0_i32_0 = arith.constant 0 : i32
    %c0_i32_1 = arith.constant 0 : i32
    return %c0_i32, %c0_i32_0 : i32, i32
  }
  func.func @transform_9(%arg0: i32) -> (i32, i32, i32) {
    %c0_i32 = arith.constant 0 : i32
    %c0_i32_0 = arith.constant 0 : i32
    %c0_i32_1 = arith.constant 0 : i32
    %c0_i32_2 = arith.constant 0 : i32
    return %c0_i32, %c0_i32_0, %c0_i32_1 : i32, i32, i32
  }
  func.func @transform_10(%arg0: i32) -> (i32, i32, i32) {
    %c0_i32 = arith.constant 0 : i32
    %c0_i32_0 = arith.constant 0 : i32
    %c0_i32_1 = arith.constant 0 : i32
    %c0_i32_2 = arith.constant 0 : i32
    return %c0_i32, %c0_i32_0, %c0_i32_1 : i32, i32, i32
  }
}

</mosaic_0001>

<bundles_post_ra>
// kernel: tpu_custom_call.1
= control target key start
LH: loop header
LB: loop body
LE: loop exit
PB: predicated region body
PF: predicated region fallthrough
CT: control target
= control target key end

     0   :  { %16 = vsyncpa [#allocation3], 0  ;;  %s1505_s0 = inlined_call_operand.hbm [shape: f32[2,8,32], index: 0, kind: input, shape index: {}]   ;;  %s1506_s1 = inlined_call_operand.hbm [shape: f32[2,8,32], index: 1, kind: input, shape index: {}]   ;;  %s1507_s2 = inlined_call_operand.hbm [shape: f32[2,8,32], index: 2, kind: input, shape index: {}]   ;;  %s1508_s3 = inlined_call_operand.hbm [shape: f32[32,32], index: 3, kind: input, shape index: {}]   ;;  %s1509_s4 = inlined_call_operand.hbm [shape: f32[32,32], index: 4, kind: input, shape index: {}]   ;;  %s1510_s5 = inlined_call_operand.hbm [shape: f32[32,32], index: 5, kind: input, shape index: {}]   ;;  %s1511_s6 = inlined_call_operand.vmem [shape: f32[1,32], index: 6, kind: input, shape index: {}]   ;;  %s1512_s7 = inlined_call_operand.vmem [shape: f32[1,32], index: 7, kind: input, shape index: {}]   ;;  %s1513_s8 = inlined_call_operand.vmem [shape: f32[1,32], index: 8, kind: input, shape index: {}]   ;;  %s1514_s9 = inlined_call_operand.hbm [shape: f32[2,8,32], index: 9, kind: output, shape index: {0}]   ;;  %s1515_s10 = inlined_call_operand.hbm [shape: f32[2,8,32], index: 10, kind: output, shape index: {1}]  }
   0x1   :  { %17 = vsyncpa [#allocation6], 0 }
   0x2   :  { %18 = vsyncpa [#allocation9], 0 }
   0x3   :  { %19 = vsyncpa [#allocation12], 0 }
   0x4   :  { %20 = vsyncpa [#allocation4], 0 }
   0x5   :  { %21 = vsyncpa [#allocation15], 0  ;;  %s39_s15 = sshll.u32 %s1506_s1, 4  ;;  %s1230_s16 = smov [#allocation5]   ;;  %s40_s15 = int_to_ptr.hbm [resolvable:$true] %s39_s15 }
   0x6   :  { %s41_s17 = sshll.u32 %s1230_s16, 4  ;;  %s65_s20 = sshll.u32 %s1508_s3, 4  ;;  %s42_s17 = int_to_ptr.vmem [resolvable:$true] %s41_s17  ;;  %s66_s20 = int_to_ptr.hbm [resolvable:$true] %s65_s20 }
   0x7   :  { %s1231_s21 = smov 128   ;;  %s1232_s22 = smov 8  }
   0x8   :  { %47 = dma.hbm_to_vmem [thread:$0]  %s40_s15, 256, %s42_s17, [#allocation6], %s1231_s21, %s1231_s21, %s1232_s22  }
   0x9   :  { %s1233_s23 = smov [#allocation8]   ;;  %s26_s1 = sshll.u32 %s1505_s0, 4  ;;  %s27_s1 = int_to_ptr.hbm [resolvable:$true] %s26_s1 }
   0xa   :  { %s67_s24 = sshll.u32 %s1233_s23, 4  ;;  %s52_s28 = sshll.u32 %s1507_s2, 4  ;;  %s68_s24 = int_to_ptr.vmem [resolvable:$true] %s67_s24  ;;  %s53_s28 = int_to_ptr.hbm [resolvable:$true] %s52_s28 }
   0xb   :  { %73 = dma.hbm_to_vmem [thread:$0]  %s66_s20, 512, %s68_s24, [#allocation9], %s1231_s21, %s1231_s21, %s1232_s22  }
   0xc   :  { %s1234_s29 = smov [#allocation2]   ;;  %s1235_s11 = smov [#allocation7]  }
   0xd   :  { %s28_s30 = sshll.u32 %s1234_s29, 4  ;;  %s54_s0 = sshll.u32 %s1235_s11, 4  ;;  %s29_s30 = int_to_ptr.vmem [resolvable:$true] %s28_s30  ;;  %s55_s0 = int_to_ptr.vmem [resolvable:$true] %s54_s0 }
   0xe   :  { %34 = dma.hbm_to_vmem [thread:$0]  %s27_s1, 256, %s29_s30, [#allocation3], %s1231_s21, %s1231_s21, %s1232_s22  }
   0xf   :  { %s78_s14 = sshll.u32 %s1509_s4, 4  ;;  %s91_s16 = sshll.u32 %s1510_s5, 4  ;;  %s79_s14 = int_to_ptr.hbm [resolvable:$true] %s78_s14  ;;  %s92_s16 = int_to_ptr.hbm [resolvable:$true] %s91_s16 }
  0x10   :  { %60 = dma.hbm_to_vmem [thread:$0]  %s53_s28, 256, %s55_s0, [#allocation6], %s1231_s21, %s1231_s21, %s1232_s22  }
  0x11   :  { %s1236_s17 = smov [#allocation10]   ;;  %s1237_s19 = smov [#allocation11]  }
  0x12   :  { %s80_s18 = sshll.u32 %s1236_s17, 4  ;;  %s93_s4 = sshll.u32 %s1237_s19, 4  ;;  %s81_s18 = int_to_ptr.vmem [resolvable:$true] %s80_s18  ;;  %s94_s4 = int_to_ptr.vmem [resolvable:$true] %s93_s4 }
  0x13   :  { %86 = dma.hbm_to_vmem [thread:$0]  %s79_s14, 512, %s81_s18, [#allocation9], %s1231_s21, %s1231_s21, %s1232_s22  }
  0x14   :  { %99 = dma.hbm_to_vmem [thread:$0]  %s92_s16, 512, %s94_s4, [#allocation12], %s1231_s21, %s1231_s21, %s1232_s22  }
  0x15   :  { %1218 = dma.done.wait [#allocation3], 256  }
  0x16   :  { %1219 = vsyncadd [#allocation3], 4294967040 }
  0x17   :  { %1220 = dma.done.wait [#allocation6], 512  }
  0x18   :  { %1221 = vsyncadd [#allocation6], 4294966784 }
  0x19   :  { %1222 = dma.done.wait [#allocation9], 1024  }
  0x1a   :  { %1223 = vsyncadd [#allocation9], 4294966272 }
  0x1b   :  { %1224 = dma.done.wait [#allocation12], 512  }
  0x1c   :  { %1225 = vsyncadd [#allocation12], 4294966784  ;;  %v139_v0 = vld [vmem:[#allocation8 + $0x18] sm:$0xff]  ;;  %v138_v2 = vld [vmem:[#allocation8 + $0x10] sm:$0xff]  ;;  %vm144_vm0 = vcmask 261120   ;;  %vm248_vm1 = vcmask 64512  }
  0x1d   :  { %v177_v1 = vld [vmem:[#allocation10 + $0x18] sm:$0xff]  ;;  %163 = vmatpush.msra.mxu0 %v139_v0  ;;  %v176_v3 = vld [vmem:[#allocation10 + $0x10] sm:$0xff]  ;;  %v137_v4 = vld [vmem:[#allocation8 + $0x8] sm:$0xff]  ;;  %s1238_s25 = smov 112   ;;  %s1239_s26 = smov 120  }
  0x1e   :  { %200 = vmatpush.msra.mxu1 %v177_v1  ;;  %v175_v5 = vld [vmem:[#allocation10 + $0x8] sm:$0xff]  ;;  %v136_v6 = vld [vmem:[#allocation8] sm:$0xff]  ;;  %v214_v8 = vld [vmem:[#allocation11 + $0x18] sm:$0xff]  ;;  %s1240_s1 = smov 104   ;;  %s1242_s3 = smov 24  }
  0x1f   :  { %164 = vmatpush.msra.mxu0 %v138_v2  ;;  %v174_v7 = vld [vmem:[#allocation10] sm:$0xff]  ;;  %v130_v9 = vld [vmem:[#allocation2] sm:$0xff]  ;;  %237 = vmatpush.msra.mxu2 %v214_v8  ;;  %v212_v12 = vld [vmem:[#allocation11 + $0x8] sm:$0xff]  ;;  %s1243_s27 = smov [#allocation13]   ;;  %s907_s11 = sshll.u32 %s1514_s9, 4  ;;  %s908_s11 = int_to_ptr.hbm [resolvable:$true] %s907_s11 }
  0x20   :  { %201 = vmatpush.msra.mxu1 %v176_v3  ;;  %v132_v10 = vld [vmem:[#allocation5] sm:$0xff]  ;;  %v213_v11 = vld [vmem:[#allocation11 + $0x10] sm:$0xff]  ;;  %v131_v15 = vld [vmem:[#allocation2 + $0x8] sm:$0xff]  ;;  %s905_s28 = sshll.u32 %s1243_s27, 4  ;;  %s1244_s0 = smov [#allocation14]   ;;  %s906_s28 = int_to_ptr.vmem [resolvable:$true] %s905_s28 }
  0x21   :  { %165 = vmatpush.msra.mxu0 %v137_v4  ;;  %238 = vmatpush.msra.mxu2 %v213_v11  ;;  %v211_v13 = vld [vmem:[#allocation11] sm:$0xff]  ;;  %v134_v14 = vld [vmem:[#allocation7] sm:$0xff]  ;;  %v133_v16 = vld [vmem:[#allocation5 + $0x8] sm:$0xff]  ;;  %s918_s12 = sshll.u32 %s1244_s0, 4  ;;  %s920_s9 = sshll.u32 %s1515_s10, 4  ;;  %s919_s12 = int_to_ptr.vmem [resolvable:$true] %s918_s12  ;;  %s921_s9 = int_to_ptr.hbm [resolvable:$true] %s920_s9 }
  0x22   :  { %202 = vmatpush.msra.mxu1 %v175_v5  ;;  %v135_v17 = vld [vmem:[#allocation7 + $0x8] sm:$0xff]  ;;  %v991_v18 = vld [vmem:[%s1511_s6] ss:$0 sm:$0xff] }
  0x23   :  { %166 = vmatpush.msra.mxu0 %v136_v6  ;;  %239 = vmatpush.msra.mxu2 %v212_v12  ;;  %v992_v19 = vld [vmem:[%s1512_s7] ss:$0 sm:$0xff] }
  0x24   :  { %203 = vmatpush.msra.mxu1 %v174_v7  ;;  %941 = vmatmul.msk.f32.vlgmr.msra.gmra.mxu0 %vm144_vm0, %v130_v9  ;;  %v993_v28 = vld [vmem:[%s1513_s8] ss:$0 sm:$0xff]  ;;  %s1241_s8 = smov 16  }
  0x25   :  { %943 = vmatmul.msk.f32.vlgmr.msra.gmra.mxu1 %vm144_vm0, %v132_v10  ;;  %240 = vmatpush.msra.mxu2 %v211_v13 }
  0x26   :  { %945 = vmatmul.msk.f32.vlgmr.msra.gmra.mxu2 %vm144_vm0, %v134_v14 }
  0x2c   :  { %942 = vmatmul.msk.f32.gmra.mxu0 %vm144_vm0, %v131_v15 }
  0x2d   :  { %944 = vmatmul.msk.f32.gmra.mxu1 %vm144_vm0, %v133_v16 }
  0x2e   :  { %946 = vmatmul.msk.f32.gmra.mxu2 %vm144_vm0, %v135_v17 }
  0xa1   :  { %v168_v20 = vpop.f32.mrf.mxu0 }
  0xa2   :  { %v205_v21 = vpop.f32.mrf.mxu1  ;;  %v169_v22 = vadd.f32 %v991_v18, %v168_v20 }
  0xa3   :  { %v206_v23 = vadd.f32 %v992_v19, %v205_v21 }
  0xa4   :  { %389 = vrot.lane.b32.xlu1 %v169_v22, %s1239_s26 }
  0xa5   :  { %543 = vrot.lane.b32.xlu2 %v206_v23, %s1238_s25  ;;  %391 = vrot.lane.b32.xlu0 %v206_v23, %s1239_s26 }
  0xa6   :  { %947 = vmatpush.xpose.msk.msra.mxu3 %vm248_vm1, %v206_v23 }
  0xa9   :  { %948 = vmatmul.msk.f32.vlgmr.msra.gmra.mxu3 %vm248_vm1, %v169_v22  ;;  %v171_v24 = vpop.f32.mrf.mxu0  ;;  %v242_v29 = vpop.f32.mrf.mxu2 }
  0xaa   :  { %v208_v25 = vpop.f32.mrf.mxu1  ;;  %v172_v26 = vadd.f32 %v991_v18, %v171_v24  ;;  %v1356_v30 = vadd.f32 %v993_v28, %v242_v29 }
  0xab   :  { %v209_v27 = vadd.f32 %v992_v19, %v208_v25 }
  0xac   :  { %417 = vrot.lane.b32.xlu1 %v172_v26, %s1239_s26 }
  0xad   :  { %571 = vrot.lane.b32.xlu2 %v209_v27, %s1238_s25  ;;  %419 = vrot.lane.b32.xlu0 %v209_v27, %s1239_s26 }
  0xae   :  { %949 = vmatpush.xpose.msk.msrb.mxu3 %vm248_vm1, %v209_v27 }
  0xb1   :  { %950 = vmatmul.msk.f32.vlgmr.msrb.gmra.mxu3 %vm248_vm1, %v172_v26  ;;  %v245_v31 = vpop.f32.mrf.mxu2 }
  0xb2   :  { %361 = vmatpush.msra.mxu3 %v1356_v30  ;;  %v1366_v32 = vadd.f32 %v993_v28, %v245_v31 }
  0xb4   :  { %569 = vrot.lane.b32.xlu1 %v172_v26, %s1238_s25  ;;  %384 = vmatpush.msrb.mxu0 %v1366_v32  ;;  %v986_v33 = vpack.i.bf16 %v1366_v32, %v1356_v30 }
  0xb5   :  { %693 = vrot.lane.b32.xlu2 %v206_v23, %s1240_s1  ;;  %541 = vrot.lane.b32.xlu0 %v169_v22, %s1238_s25 }
  0xbc   :  { %691 = vrot.lane.b32.xlu1 %v169_v22, %s1240_s1 }
  0xbd   :  { %719 = vrot.lane.b32.xlu2 %v172_v26, %s1240_s1  ;;  %721 = vrot.lane.b32.xlu0 %v209_v27, %s1240_s1 }
  0xc5   :  { %987 = vrot.lane.b32.xlu0 %v986_v33, %s1239_s26 }
  0xff   :  { %v544_v34 = vpop.permute.xlu2 %543 }
 0x107   :  { %v572_v35 = vpop.permute.xlu2 %571 }
 0x10f   :  { %v694_v38 = vpop.permute.xlu2 %693 }
 0x116   :  { %v390_v37 = vpop.permute.xlu1 %389 }
 0x117   :  { %v392_v36 = vpop.permute.xlu0 %391  ;;  %v720_v47 = vpop.permute.xlu2 %719 }
 0x118   :  { %953 = vmatpush.xpose.msk.msrb.mxu1 %vm248_vm1, %v392_v36 }
 0x11b   :  { %954 = vmatmul.msk.f32.vlgmr.msrb.gmra.mxu1 %vm248_vm1, %v390_v37 }
 0x11c   :  { %959 = vmatpush.xpose.msk.msra.mxu1 %vm248_vm1, %v544_v34 }
 0x11e   :  { %v418_v40 = vpop.permute.xlu1 %417 }
 0x11f   :  { %v420_v39 = vpop.permute.xlu0 %419 }
 0x120   :  { %965 = vmatpush.xpose.msk.msrb.mxu1 %vm248_vm1, %v694_v38  ;;  %955 = vmatpush.xpose.msk.msrb.mxu2 %vm248_vm1, %v420_v39 }
 0x123   :  { %956 = vmatmul.msk.f32.vlgmr.msrb.gmra.mxu2 %vm248_vm1, %v418_v40 }
 0x124   :  { %961 = vmatpush.xpose.msk.msra.mxu2 %vm248_vm1, %v572_v35 }
 0x126   :  { %v570_v42 = vpop.permute.xlu1 %569 }
 0x127   :  { %v542_v41 = vpop.permute.xlu0 %541 }
 0x128   :  { %960 = vmatmul.msk.f32.vlgmr.msra.gmra.mxu1 %vm248_vm1, %v542_v41 }
 0x12b   :  { %962 = vmatmul.msk.f32.vlgmr.msra.gmra.mxu2 %vm248_vm1, %v570_v42 }
 0x12c   :  { %v272_v43 = vpop.f32.mrf.mxu3 }
 0x12d   :  { %v301_v44 = vmul.f32 1.442695, %v272_v43 }
 0x12e   :  { %v692_v46 = vpop.permute.xlu1 %691 }
 0x12f   :  { %994 = vpow2.f32 %v301_v44  ;;  %v722_v45 = vpop.permute.xlu0 %721 }
 0x130   :  { %967 = vmatpush.xpose.msk.msrb.mxu2 %vm248_vm1, %v722_v45  ;;  %966 = vmatmul.msk.f32.vlgmr.msrb.gmra.mxu1 %vm248_vm1, %v692_v46 }
 0x133   :  { %968 = vmatmul.msk.f32.vlgmr.msrb.gmra.mxu2 %vm248_vm1, %v720_v47 }
 0x134   :  { %v298_v48 = vpop.f32.mrf.mxu3 }
 0x135   :  { %v1383_v49 = vpop.eup %994  ;;  %v303_v50 = vmul.f32 1.442695, %v298_v48 }
 0x136   :  { %v305_v51 = vsel %vm248_vm1, %v1383_v49, 0.0 }
 0x137   :  { %996 = vpow2.f32 %v303_v50  ;;  %306 = vadd.xlane.f32.xlu0 %v305_v51  ;;  %v988_v54 = vpop.permute.xlu0 %987 }
 0x138   :  { %v990_v55 = vunpack.i.h.bf16 %v988_v54  ;;  %v989_v56 = vunpack.i.l.bf16 %v988_v54 }
 0x13a   :  { %509 = vmatpush.msrb.mxu3 %v989_v56  ;;  %536 = vmatpush.msra.mxu0 %v990_v55 }
 0x13d   :  { %v1387_v52 = vpop.eup %996 }
 0x13e   :  { %v308_v53 = vsel %vm248_vm1, %v1387_v52, 0.0 }
 0x13f   :  { %309 = vadd.xlane.f32.xlu1 %v308_v53 }
 0x198   :  { %v414_v57 = vpop.f32.mrf.mxu1 }
 0x199   :  { %v445_v58 = vmul.f32 1.442695, %v414_v57 }
 0x19b   :  { %998 = vpow2.f32 %v445_v58 }
 0x1a1   :  { %v1391_v59 = vpop.eup %998 }
 0x1a2   :  { %v449_v60 = vsel %vm248_vm1, %v1391_v59, 0.0 }
 0x1a3   :  { %450 = vadd.xlane.f32.xlu2 %v449_v60 }
 0x1a5   :  { %v566_v61 = vpop.f32.mrf.mxu1 }
 0x1a6   :  { %v597_v62 = vmul.f32 1.442695, %v566_v61  ;;  %v442_v63 = vpop.f32.mrf.mxu2 }
 0x1a7   :  { %v447_v0 = vmul.f32 1.442695, %v442_v63 }
 0x1a8   :  { %1000 = vpow2.f32 %v597_v62 }
 0x1a9   :  { %1002 = vpow2.f32 %v447_v0 }
 0x1aa   :  { %v307_v1 = vpop.xlane.xlu0 %306 }
 0x1ab   :  { %v311_v2 = vadd.f32 1e-08, %v307_v1 }
 0x1ad   :  { %1004 = vrcp.f32 %v311_v2  ;;  %v716_v4 = vpop.f32.mrf.mxu1  ;;  %v324_v18 = vand.u32 2147483648, %v311_v2  ;;  %v322_v22 = vand.u32 2147483647, %v311_v2  ;;  %vm318_vm3 = vweird.f32 %v311_v2 }
 0x1ae   :  { %v1395_v3 = vpop.eup %1000  ;;  %v594_v5 = vpop.f32.mrf.mxu2  ;;  %v747_v7 = vmul.f32 1.442695, %v716_v4 }
 0x1af   :  { %v1397_v6 = vpop.eup %1002  ;;  %v599_v8 = vmul.f32 1.442695, %v594_v5  ;;  %v601_v9 = vsel %vm248_vm1, %v1395_v3, 0.0  ;;  %v325_v27 = vor.u32 1.1754944e-38, %v324_v18  ;;  %vm323_vm5 = vcmp.eq.f32.partialorder %v322_v22, 8.507059e+37 }
 0x1b0   :  { %v452_v10 = vsel %vm248_vm1, %v1397_v6, 0.0  ;;  %1006 = vpow2.f32 %v747_v7  ;;  %602 = vadd.xlane.f32.xlu0 %v601_v9 }
 0x1b1   :  { %453 = vadd.xlane.f32.xlu2 %v452_v10  ;;  %1008 = vpow2.f32 %v599_v8 }
 0x1b2   :  { %v310_v11 = vpop.xlane.xlu1 %309 }
 0x1b3   :  { %v1005_v12 = vpop.eup %1004  ;;  %v312_v13 = vadd.f32 1e-08, %v310_v11 }
 0x1b4   :  { %v314_v14 = vmul.f32 %v1005_v12, %v311_v2  ;;  %vm319_vm2 = vweird.f32 %v1005_v12 }
 0x1b5   :  { %1010 = vrcp.f32 %v312_v13  ;;  %vm320_vm4 = vmor %vm318_vm3, %vm319_vm2  ;;  %v338_v36 = vand.u32 2147483648, %v312_v13  ;;  %v336_v39 = vand.u32 2147483647, %v312_v13  ;;  %vm332_vm7 = vweird.f32 %v312_v13 }
 0x1b6   :  { %v315_v15 = vsub.f32 1.0, %v314_v14  ;;  %v744_v16 = vpop.f32.mrf.mxu2  ;;  %v1403_v17 = vpop.eup %1006 }
 0x1b7   :  { %v749_v19 = vmul.f32 1.442695, %v744_v16  ;;  %v1405_v20 = vpop.eup %1008  ;;  %v751_v23 = vsel %vm248_vm1, %v1403_v17, 0.0  ;;  %v339_v41 = vor.u32 1.1754944e-38, %v338_v36  ;;  %vm337_vm9 = vcmp.eq.f32.partialorder %v336_v39, 8.507059e+37 }
 0x1b8   :  { %v316_v21 = vmul.f32 %v1005_v12, %v315_v15  ;;  %v604_v24 = vsel %vm248_vm1, %v1405_v20, 0.0 }
 0x1b9   :  { %1012 = vpow2.f32 %v749_v19  ;;  %752 = vadd.xlane.f32.xlu2 %v751_v23  ;;  %605 = vadd.xlane.f32.xlu1 %v604_v24 }
 0x1ba   :  { %v317_v25 = vadd.f32 %v1005_v12, %v316_v21 }
 0x1bb   :  { %v1011_v26 = vpop.eup %1010 }
 0x1bc   :  { %v328_v28 = vmul.f32 %v1011_v26, %v312_v13  ;;  %v321_v29 = vsel %vm320_vm4, %v1005_v12, %v317_v25  ;;  %vm333_vm6 = vweird.f32 %v1011_v26 }
 0x1bd   :  { %v326_v31 = vsel %vm323_vm5, %v325_v27, %v321_v29  ;;  %vm334_vm8 = vmor %vm332_vm7, %vm333_vm6 }
 0x1be   :  { %v329_v33 = vsub.f32 1.0, %v328_v28  ;;  %v1412_v34 = vmul.f32 %v1383_v49, %v326_v31 }
 0x1bf   :  { %v1414_v35 = vpop.eup %1012 }
 0x1c0   :  { %v330_v37 = vmul.f32 %v1011_v26, %v329_v33  ;;  %951 = vmatmul.msk.f32.vlgmr.msra.gmra.mxu3 %vm248_vm1, %v1412_v34  ;;  %v754_v38 = vsel %vm248_vm1, %v1414_v35, 0.0 }
 0x1c1   :  { %755 = vadd.xlane.f32.xlu1 %v754_v38 }
 0x1c2   :  { %v331_v40 = vadd.f32 %v1011_v26, %v330_v37 }
 0x1c4   :  { %v335_v42 = vsel %vm334_vm8, %v1011_v26, %v331_v40  ;;  %789 = vrot.lane.b32.xlu0 %v1356_v30, %s1240_s1 }
 0x1c5   :  { %v340_v43 = vsel %vm337_vm9, %v339_v41, %v335_v42 }
 0x1c6   :  { %v1423_v44 = vmul.f32 %v1387_v52, %v340_v43 }
 0x1c8   :  { %952 = vmatmul.msk.f32.vlgmr.msrb.gmra.mxu0 %vm248_vm1, %v1423_v44 }
 0x1cc   :  { %815 = vrot.lane.b32.xlu0 %v1366_v32, %s1240_s1 }
 0x1d1   :  { %639 = vrot.lane.b32.xlu2 %v1356_v30, %s1238_s25 }
 0x1da   :  { %665 = vrot.lane.b32.xlu1 %v1366_v32, %s1238_s25 }
 0x216   :  { %v451_v45 = vpop.xlane.xlu2 %450 }
 0x217   :  { %v455_v46 = vadd.f32 1e-08, %v451_v45 }
 0x219   :  { %1014 = vrcp.f32 %v455_v46  ;;  %v468_v50 = vand.u32 2147483648, %v455_v46  ;;  %v466_v52 = vand.u32 2147483647, %v455_v46  ;;  %vm462_vm11 = vweird.f32 %v455_v46 }
 0x21b   :  { %v469_v30 = vor.u32 1.1754944e-38, %v468_v50  ;;  %vm467_vm13 = vcmp.eq.f32.partialorder %v466_v52, 8.507059e+37 }
 0x21f   :  { %v1015_v47 = vpop.eup %1014 }
 0x220   :  { %v458_v48 = vmul.f32 %v1015_v47, %v455_v46  ;;  %vm463_vm10 = vweird.f32 %v1015_v47 }
 0x221   :  { %vm464_vm12 = vmor %vm462_vm11, %vm463_vm10 }
 0x222   :  { %v459_v49 = vsub.f32 1.0, %v458_v48 }
 0x223   :  { %v603_v53 = vpop.xlane.xlu0 %602 }
 0x224   :  { %v460_v51 = vmul.f32 %v1015_v47, %v459_v49  ;;  %v454_v54 = vpop.xlane.xlu2 %453  ;;  %v607_v55 = vadd.f32 1e-08, %v603_v53 }
 0x225   :  { %v456_v56 = vadd.f32 1e-08, %v454_v54 }
 0x226   :  { %v461_v57 = vadd.f32 %v1015_v47, %v460_v51  ;;  %1016 = vrcp.f32 %v607_v55  ;;  %v618_v10 = vand.u32 2147483647, %v607_v55  ;;  %vm614_vm2 = vweird.f32 %v607_v55 }
 0x227   :  { %1018 = vrcp.f32 %v456_v56  ;;  %v482_v12 = vand.u32 2147483648, %v456_v56  ;;  %v480_v15 = vand.u32 2147483647, %v456_v56  ;;  %vm476_vm4 = vweird.f32 %v456_v56 }
 0x228   :  { %v465_v32 = vsel %vm464_vm12, %v1015_v47, %v461_v57  ;;  %vm619_vm5 = vcmp.eq.f32.partialorder %v618_v10, 8.507059e+37 }
 0x229   :  { %v470_v58 = vsel %vm467_vm13, %v469_v30, %v465_v32  ;;  %v483_v31 = vor.u32 1.1754944e-38, %v482_v12  ;;  %vm481_vm7 = vcmp.eq.f32.partialorder %v480_v15, 8.507059e+37 }
 0x22a   :  { %v485_v60 = vmul.f32 %v1391_v59, %v470_v58  ;;  %v620_v59 = vand.u32 2147483648, %v607_v55 }
 0x22c   :  { %v753_v61 = vpop.xlane.xlu2 %752  ;;  %957 = vmatmul.msk.f32.vlgmr.msrb.gmra.mxu3 %vm248_vm1, %v485_v60  ;;  %875 = vrot.lane.b32.xlu1 %v485_v60, %s1232_s22  ;;  %v1017_v62 = vpop.eup %1016  ;;  %v621_v19 = vor.u32 1.1754944e-38, %v620_v59 }
 0x22d   :  { %v1436_v63 = vadd.f32 1e-08, %v753_v61  ;;  %v606_v0 = vpop.xlane.xlu1 %605  ;;  %v1019_v1 = vpop.eup %1018  ;;  %v610_v2 = vmul.f32 %v1017_v62, %v607_v55  ;;  %vm615_vm14 = vweird.f32 %v1017_v62 }
 0x22e   :  { %v1438_v4 = vadd.f32 1e-08, %v606_v0  ;;  %v472_v5 = vmul.f32 %v1019_v1, %v456_v56  ;;  %vm477_vm15 = vweird.f32 %v1019_v1  ;;  %vm616_vm3 = vmor %vm614_vm2, %vm615_vm14 }
 0x22f   :  { %1020 = vrcp.f32 %v1436_v63  ;;  %v611_v7 = vsub.f32 1.0, %v610_v2  ;;  %vm478_vm6 = vmor %vm476_vm4, %vm477_vm15  ;;  %v768_v36 = vand.u32 2147483647, %v1436_v63  ;;  %v770_v37 = vand.u32 2147483648, %v1436_v63 }
 0x230   :  { %1022 = vrcp.f32 %v1438_v4  ;;  %v473_v8 = vsub.f32 1.0, %v472_v5  ;;  %v634_v43 = vand.u32 2147483648, %v1438_v4  ;;  %v632_v46 = vand.u32 2147483647, %v1438_v4 }
 0x231   :  { %v612_v9 = vmul.f32 %v1017_v62, %v611_v7  ;;  %vm764_vm10 = vweird.f32 %v1436_v63  ;;  %vm628_vm12 = vweird.f32 %v1438_v4  ;;  %vm769_vm13 = vcmp.eq.f32.partialorder %v768_v36, 8.507059e+37 }
 0x232   :  { %v474_v11 = vmul.f32 %v1019_v1, %v473_v8  ;;  %v635_v50 = vor.u32 1.1754944e-38, %v634_v43  ;;  %vm633_vm15 = vcmp.eq.f32.partialorder %v632_v46, 8.507059e+37 }
 0x233   :  { %v613_v14 = vadd.f32 %v1017_v62, %v612_v9 }
 0x234   :  { %v640_v13 = vpop.permute.xlu2 %639  ;;  %v475_v21 = vadd.f32 %v1019_v1, %v474_v11 }
 0x235   :  { %v1021_v16 = vpop.eup %1020  ;;  %v756_v18 = vpop.xlane.xlu1 %755  ;;  %660 = vmatpush.msra.mxu3 %v640_v13  ;;  %v617_v25 = vsel %vm616_vm3, %v1017_v62, %v613_v14 }
 0x236   :  { %v1023_v22 = vpop.eup %1022  ;;  %v760_v23 = vmul.f32 %v1021_v16, %v1436_v63  ;;  %v1443_v24 = vadd.f32 1e-08, %v756_v18  ;;  %v790_v27 = vpop.permute.xlu0 %789  ;;  %v622_v28 = vsel %vm619_vm5, %v621_v19, %v617_v25  ;;  %v479_v29 = vsel %vm478_vm6, %v1019_v1, %v475_v21 }
 0x237   :  { %v624_v26 = vmul.f32 %v1023_v22, %v1438_v4  ;;  %810 = vmatpush.msrb.mxu3 %v790_v27  ;;  %v637_v39 = vmul.f32 %v1395_v3, %v622_v28  ;;  %v484_v40 = vsel %vm481_vm7, %v483_v31, %v479_v29  ;;  %vm765_vm8 = vweird.f32 %v1021_v16 }
 0x238   :  { %v761_v33 = vsub.f32 1.0, %v760_v23  ;;  %1024 = vrcp.f32 %v1443_v24  ;;  %v486_v42 = vmul.f32 %v1397_v6, %v484_v40  ;;  %vm629_vm9 = vweird.f32 %v1023_v22  ;;  %vm766_vm11 = vmor %vm764_vm10, %vm765_vm8 }
 0x239   :  { %v625_v38 = vsub.f32 1.0, %v624_v26  ;;  %881 = vrot.lane.b32.xlu2 %v637_v39, %s1241_s8  ;;  %963 = vmatmul.msk.f32.vlgmr.msra.gmra.mxu3 %vm248_vm1, %v637_v39  ;;  %v771_v3 = vor.u32 1.1754944e-38, %v770_v37  ;;  %vm630_vm14 = vmor %vm628_vm12, %vm629_vm9  ;;  %v784_v58 = vand.u32 2147483648, %v1443_v24  ;;  %vm778_vm3 = vweird.f32 %v1443_v24 }
 0x23a   :  { %v762_v41 = vmul.f32 %v1021_v16, %v761_v33  ;;  %877 = vrot.lane.b32.xlu0 %v486_v42, %s1232_s22  ;;  %958 = vmatmul.msk.f32.vlgmr.msra.gmra.mxu0 %vm248_vm1, %v486_v42  ;;  %v782_v60 = vand.u32 2147483647, %v1443_v24  ;;  %vm870_vm6 = vcmask 195584   ;;  %vm867_vm7 = vcmask 130048  }
 0x23b   :  { %v626_v45 = vmul.f32 %v1023_v22, %v625_v38  ;;  %v785_v62 = vor.u32 1.1754944e-38, %v784_v58 }
 0x23c   :  { %v763_v47 = vadd.f32 %v1021_v16, %v762_v41  ;;  %vm783_vm5 = vcmp.eq.f32.partialorder %v782_v60, 8.507059e+37 }
 0x23d   :  { %v627_v6 = vadd.f32 %v1023_v22, %v626_v45 }
 0x23e   :  { %v1025_v48 = vpop.eup %1024  ;;  %v767_v49 = vsel %vm766_vm11, %v1021_v16, %v763_v47 }
 0x23f   :  { %v774_v51 = vmul.f32 %v1025_v48, %v1443_v24  ;;  %v772_v52 = vsel %vm769_vm13, %v771_v3, %v767_v49  ;;  %v631_v53 = vsel %vm630_vm14, %v1023_v22, %v627_v6  ;;  %vm779_vm2 = vweird.f32 %v1025_v48 }
 0x240   :  { %v787_v54 = vmul.f32 %v1403_v17, %v772_v52  ;;  %v636_v55 = vsel %vm633_vm15, %v635_v50, %v631_v53  ;;  %vm780_vm4 = vmor %vm778_vm3, %vm779_vm2  ;;  %v816_v17 = vpop.permute.xlu0 %815 }
 0x241   :  { %v638_v56 = vmul.f32 %v1405_v20, %v636_v55  ;;  %v775_v57 = vsub.f32 1.0, %v774_v51 }
 0x242   :  { %969 = vmatmul.msk.f32.vlgmr.msrb.gmra.mxu3 %vm248_vm1, %v787_v54 }
 0x243   :  { %883 = vrot.lane.b32.xlu1 %v638_v56, %s1241_s8  ;;  %v776_v30 = vmul.f32 %v1025_v48, %v775_v57  ;;  %v363_v1 = vpop.f32.mrf.mxu3 }
 0x245   :  { %v777_v32 = vadd.f32 %v1025_v48, %v776_v30  ;;  %v386_v4 = vpop.f32.mrf.mxu0 }
 0x247   :  { %v781_v20 = vsel %vm780_vm4, %v1025_v48, %v777_v32 }
 0x248   :  { %v786_v63 = vsel %vm783_vm5, %v785_v62, %v781_v20 }
 0x249   :  { %v788_v0 = vmul.f32 %v1414_v35, %v786_v63 }
 0x24c   :  { %v666_v61 = vpop.permute.xlu1 %665 }
 0x24d   :  { %686 = vmatpush.msrb.mxu0 %v666_v61 }
 0x24e   :  { %964 = vmatmul.msk.f32.vlgmr.msrb.gmra.mxu0 %vm248_vm1, %v638_v56 }
 0x24f   :  { %836 = vmatpush.msra.mxu0 %v816_v17 }
 0x256   :  { %970 = vmatmul.msk.f32.vlgmr.msra.gmra.mxu0 %vm248_vm1, %v788_v0 }
 0x293   :  { %v882_v9 = vpop.permute.xlu2 %881 }
 0x29e   :  { %v876_v10 = vpop.permute.xlu1 %875 }
 0x29f   :  { %v893_v22 = vsel %vm248_vm1, %v1412_v34, %v876_v10 }
 0x2a0   :  { %v895_v24 = vsel %vm867_vm7, %v893_v22, %v882_v9 }
 0x2ac   :  { %v878_v14 = vpop.permute.xlu0 %877 }
 0x2ad   :  { %v894_v31 = vsel %vm248_vm1, %v1423_v44, %v878_v14 }
 0x2af   :  { %v511_v2 = vpop.f32.mrf.mxu3 }
 0x2b0   :  { %843 = vrot.lane.b32.xlu2 %v511_v2, %s1232_s22 }
 0x2b5   :  { %v884_v12 = vpop.permute.xlu1 %883 }
 0x2b6   :  { %v896_v33 = vsel %vm867_vm7, %v894_v31, %v884_v12 }
 0x2b7   :  { %v538_v5 = vpop.f32.mrf.mxu0 }
 0x2b8   :  { %845 = vrot.lane.b32.xlu1 %v538_v5, %s1232_s22 }
 0x2bc   :  { %v662_v7 = vpop.f32.mrf.mxu3 }
 0x2bd   :  { %851 = vrot.lane.b32.xlu0 %v662_v7, %s1241_s8 }
 0x2c0   :  { %887 = vrot.lane.b32.xlu1 %v787_v54, %s1242_s3 }
 0x2c5   :  { %v812_v59 = vpop.f32.mrf.mxu3 }
 0x2c6   :  { %859 = vrot.lane.b32.xlu0 %v812_v59, %s1242_s3 }
 0x2cb   :  { %v688_v8 = vpop.f32.mrf.mxu0 }
 0x2cc   :  { %853 = vrot.lane.b32.xlu2 %v688_v8, %s1241_s8 }
 0x2ce   :  { %889 = vrot.lane.b32.xlu0 %v788_v0, %s1242_s3 }
 0x2d3   :  { %v838_v35 = vpop.f32.mrf.mxu0 }
 0x2d4   :  { %861 = vrot.lane.b32.xlu2 %v838_v35, %s1242_s3 }
 0x30a   :  { %v844_v11 = vpop.permute.xlu2 %843 }
 0x30b   :  { %v865_v27 = vsel %vm248_vm1, %v363_v1, %v844_v11 }
 0x326   :  { %v854_v13 = vpop.permute.xlu2 %853 }
 0x32a   :  { %v846_v15 = vpop.permute.xlu1 %845 }
 0x32b   :  { %v866_v16 = vsel %vm248_vm1, %v386_v4, %v846_v15 }
 0x32c   :  { %v869_v19 = vsel %vm867_vm7, %v866_v16, %v854_v13 }
 0x32e   :  { %v862_v18 = vpop.permute.xlu2 %861 }
 0x32f   :  { %v872_v21 = vsel %vm870_vm6, %v869_v19, %v862_v18  ;;  %v852_v23 = vpop.permute.xlu0 %851 }
 0x330   :  { %874 = vst.msk [vmem:[#allocation13 + $0x8] sm:$0xff] %vm144_vm0, %v872_v21  ;;  %v868_v34 = vsel %vm867_vm7, %v865_v27, %v852_v23 }
 0x332   :  { %v888_v25 = vpop.permute.xlu1 %887 }
 0x333   :  { %v897_v26 = vsel %vm870_vm6, %v895_v24, %v888_v25 }
 0x334   :  { %899 = vst.msk [vmem:[#allocation14] sm:$0xff] %vm144_vm0, %v897_v26 }
 0x338   :  { %v860_v28 = vpop.permute.xlu0 %859 }
 0x339   :  { %v871_v29 = vsel %vm870_vm6, %v868_v34, %v860_v28 }
 0x33a   :  { %873 = vst.msk [vmem:[#allocation13] sm:$0xff] %vm144_vm0, %v871_v29 }
 0x33b   :  { %913 = dma.vmem_to_hbm [thread:$0]  %s906_s28, 256, %s908_s11, [#allocation4], %s1231_s21, %s1231_s21, %s1232_s22  }
 0x340   :  { %v890_v36 = vpop.permute.xlu0 %889 }
 0x341   :  { %v898_v37 = vsel %vm870_vm6, %v896_v33, %v890_v36 }
 0x342   :  { %900 = vst.msk [vmem:[#allocation14 + $0x8] sm:$0xff] %vm144_vm0, %v898_v37 }
 0x343   :  { %926 = dma.vmem_to_hbm [thread:$0]  %s919_s12, 256, %s921_s9, [#allocation15], %s1231_s21, %s1231_s21, %s1232_s22  }
 0x344   :  { %1226 = dma.done.wait [#allocation4], 256  }
 0x345   :  { %1227 = vsyncadd [#allocation4], 4294967040 }
 0x346   :  { %1228 = dma.done.wait [#allocation15], 256  }
 0x347   :  { %1229 = vsyncadd [#allocation15], 4294967040 }
 0x348   :  { %935 = vsyncpa [#allocation3], 1 }
 0x349   :  { %936 = vsyncpa [#allocation6], 1 }
 0x34a   :  { %937 = vsyncpa [#allocation9], 1 }
 0x34b   :  { %938 = vsyncpa [#allocation12], 1 }
 0x34c   :  { %939 = vsyncpa [#allocation4], 1 }
 0x34d   :  { %940 = vsyncpa [#allocation15], 1 }

</bundles_post_ra>
